<compile_context>
chip_gen: v7x
topology: tpu7x:2x2x1
jax: 0.10.0
libtpu: 0.0.40
codegen_flags: <defaults>
</compile_context>

<pallas_src>
import math

import jax
import jax.numpy as jnp
from jax.experimental import pallas as pl
from jax.experimental.pallas import tpu as pltpu


def _round_up(x: int, m: int) -> int:
    return (x + m - 1) // m * m


def make_mha_kernel(block_b: int, seq: int, e_pad: int, head_dim: int):
    rows = block_b * seq

    def mha_kernel(x_ref, wqkv_ref, wp_ref, bp_ref, o_ref, acc_ref):
        h = pl.program_id(1)

        @pl.when(h == 0)
        def _init():
            acc_ref[...] = jnp.zeros_like(acc_ref)

        # (bb, S, Ep) -> (bb*S, Ep); cast once for the MXU (f32 accumulation).
        xf = x_ref[...].reshape(rows, e_pad).astype(jnp.bfloat16)

        # This head's Q / K / V projections.  K = e_pad (lane-dense, 128-mult).
        # The sqrt(head_dim) score scale is pre-baked into the Q columns.
        q = jnp.dot(xf, wqkv_ref[0], preferred_element_type=jnp.float32)
        k = jnp.dot(xf, wqkv_ref[1], preferred_element_type=jnp.float32)
        v = jnp.dot(xf, wqkv_ref[2], preferred_element_type=jnp.float32)

        qb = q.reshape(block_b, seq, head_dim).astype(jnp.bfloat16)
        kb = k.reshape(block_b, seq, head_dim).astype(jnp.bfloat16)
        vb = v.reshape(block_b, seq, head_dim).astype(jnp.bfloat16)

        # Scores / softmax in f32 on VPU/EUP; MXU operands stay bf16.
        s = jnp.einsum('bqd,bkd->bqk', qb, kb,
                       preferred_element_type=jnp.float32)           # (bb, S, S)
        s = s - jnp.max(s, axis=-1, keepdims=True)
        p = jnp.exp(s)
        p = p / jnp.sum(p, axis=-1, keepdims=True)                   # exact divide

        oh = jnp.einsum('bqk,bkd->bqd', p.astype(jnp.bfloat16), vb,
                        preferred_element_type=jnp.float32)          # (bb, S, Dh)

        # Fold head-concat + output projection:
        #   concat(heads) @ Wp == sum_h head_h @ Wp[h*Dh:(h+1)*Dh, :]
        acc_ref[...] += jnp.dot(oh.reshape(rows, head_dim).astype(jnp.bfloat16),
                                wp_ref[...],
                                preferred_element_type=jnp.float32)  # (rows, Ep)

        @pl.when(h == pl.num_programs(1) - 1)
        def _finalize():
            out = acc_ref[...] + bp_ref[...]                          # + (1, Ep)
            o_ref[...] = out.reshape(block_b, seq, e_pad).astype(o_ref.dtype)

    return mha_kernel


def _step_vmem_bytes(bb: int, seq: int, e_pad: int, head_dim: int) -> int:
    """Rough per-grid-step VMEM footprint (bytes) incl. double-buffered tiles."""
    rows = bb * seq
    dh_lane = _round_up(head_dim, 128)
    s_lane = _round_up(seq, 128)
    x_tiles = 2 * rows * e_pad * 4                                    # f32 in
    o_tiles = 2 * rows * e_pad * 4                                    # f32 out
    acc = rows * e_pad * 4                                            # f32 scratch
    w = 2 * (3 * e_pad * dh_lane + _round_up(head_dim, 16) * e_pad) * 2   # bf16
    transient = (3 * rows * dh_lane * 4      # q, k, v
                 + 2 * bb * seq * s_lane * 4  # scores + probs
                 + rows * dh_lane * 4         # head output
                 + rows * e_pad * 4)          # projection result
    return x_tiles + o_tiles + acc + w + transient + (1 << 20)


def _choose_block_b(batch: int, seq: int, e_pad: int, head_dim: int,
                    budget_bytes: int, max_rows: int = 512) -> int:
    """Largest batch block that fits the VMEM budget, preferring an even number
    of parallel grid steps (keeps both v7x TensorCores busy)."""
    divisors = [d for d in range(1, batch + 1) if batch % d == 0]
    fits = [d for d in divisors
            if d * seq <= max_rows
            and _step_vmem_bytes(d, seq, e_pad, head_dim) <= budget_bytes]
    if not fits:
        fits = [1]
    best = max(fits)
    if batch > 1 and (batch // best) % 2 == 1:
        even = [d for d in fits if (batch // d) % 2 == 0]
        if even:
            best = max(even)
    return best


def multi_head_attention(x, wq, wk, wv, wp_t, bp, *, block_b=None):
    """
    x    : (B, S, E)       float32
    wq   : (H, E, Dh)      per-head query weight, already transposed (x @ w)
    wk   : (H, E, Dh)
    wv   : (H, E, Dh)
    wp_t : (H*Dh, E)       projection weight, transposed
    bp   : (E,)            projection bias
    returns (B, S, E)
    """
    B, S, E = x.shape
    H, _, Dh = wq.shape
    scale = float(Dh) ** 0.5            # reference MULTIPLIES scores by sqrt(head_dim)
    e_pad = _round_up(E, 128)           # lane-dense embed dim
    pad_e = e_pad - E

    # ---- host-side packing: bf16 weights, scale baked into Q, E padded ----
    if pad_e:
        x_p = jnp.pad(x, ((0, 0), (0, 0), (0, pad_e)))
        wq_p = jnp.pad(wq, ((0, 0), (0, pad_e), (0, 0)))
        wk_p = jnp.pad(wk, ((0, 0), (0, pad_e), (0, 0)))
        wv_p = jnp.pad(wv, ((0, 0), (0, pad_e), (0, 0)))
    else:
        x_p, wq_p, wk_p, wv_p = x, wq, wk, wv

    w_qkv = jnp.stack([wq_p * scale, wk_p, wv_p], axis=1).astype(jnp.bfloat16)  # (H,3,Ep,Dh)
    wp_h = wp_t.reshape(H, Dh, E)
    if pad_e:
        wp_h = jnp.pad(wp_h, ((0, 0), (0, 0), (0, pad_e)))
    wp_h = wp_h.astype(jnp.bfloat16)                                            # (H,Dh,Ep)
    bp_p = (jnp.pad(bp, (0, pad_e)) if pad_e else bp).reshape(1, e_pad)          # (1,Ep) f32

    # ---- VMEM budget (conservative: fits v5e/v6e/v7x scoped VMEM) ----
    budget = 40 * (1 << 20)
    if block_b is None:
        block_b = _choose_block_b(B, S, e_pad, Dh, budget)
    n_b = B // block_b
    grid = (n_b, H)

    need = _step_vmem_bytes(block_b, S, e_pad, Dh)
    vmem_limit = int(min(56 * (1 << 20), max(32 * (1 << 20), 2 * need)))

    flops = (2 * B * S * e_pad * 3 * H * Dh        # QKV projections
             + 2 * B * H * S * S * Dh              # scores
             + 2 * B * H * S * S * Dh              # probs @ V
             + 2 * B * S * H * Dh * e_pad)         # output projection
    bytes_accessed = (B * S * e_pad * 4 * 2                            # x + out
                      + n_b * H * (3 * e_pad * Dh + Dh * e_pad) * 2    # bf16 weights / step
                      + e_pad * 4)                                     # bias
    cost = pl.CostEstimate(flops=int(flops),
                           transcendentals=int(B * H * S * S),
                           bytes_accessed=int(bytes_accessed))

    kernel = make_mha_kernel(block_b, S, e_pad, Dh)

    out_p = pl.pallas_call(
        kernel,
        out_shape=jax.ShapeDtypeStruct((B, S, e_pad), x.dtype),
        grid_spec=pltpu.PrefetchScalarGridSpec(
            num_scalar_prefetch=0,
            grid=grid,
            in_specs=[
                pl.BlockSpec((block_b, S, e_pad), lambda b, h: (b, 0, 0)),      # x tile
                pl.BlockSpec((None, 3, e_pad, Dh), lambda b, h: (h, 0, 0, 0)),  # head QKV w
                pl.BlockSpec((None, Dh, e_pad), lambda b, h: (h, 0, 0)),        # head proj w
                pl.BlockSpec((1, e_pad), lambda b, h: (0, 0)),                  # bias
            ],
            out_specs=pl.BlockSpec((block_b, S, e_pad), lambda b, h: (b, 0, 0)),
            scratch_shapes=[pltpu.VMEM((block_b * S, e_pad), jnp.float32)],
        ),
        compiler_params=pltpu.CompilerParams(
            dimension_semantics=("parallel", "arbitrary"),
            vmem_limit_bytes=vmem_limit,
        ),
        cost_estimate=cost,
    )(x_p, w_qkv, wp_h, bp_p)

    return out_p[:, :, :E] if pad_e else out_p


def reference_mha(x, wq, wk, wv, wp_t, bp):
    """Pure-JAX reference mirroring the PyTorch module semantics (f32)."""
    H, E, Dh = wq.shape
    scale = float(Dh) ** 0.5
    head_outs = []
    for h in range(H):
        q = x @ wq[h]
        k = x @ wk[h]
        v = x @ wv[h]
        w = (q @ jnp.swapaxes(k, -2, -1)) * scale
        w = jax.nn.softmax(w, axis=-1)
        head_outs.append(w @ v)
    cat = jnp.concatenate(head_outs, axis=-1)
    return cat @ wp_t + bp


if __name__ == "__main__":
    # Small, module-consistent shapes.
    B, S, E = 2, 8, 32          # batch, seq, embed_dim
    H, Dh = 4, 8                # n_heads, head_dim  (H*Dh = 32)

    key = jax.random.PRNGKey(0)
    ks = jax.random.split(key, 6)

    # Deterministic init emulating nn.Linear default: U(-1/sqrt(fan_in), 1/sqrt(fan_in)).
    lim_e = 1.0 / math.sqrt(E)
    lim_hd = 1.0 / math.sqrt(H * Dh)

    x = jax.random.normal(ks[0], (B, S, E), dtype=jnp.float32)
    wq = jax.random.uniform(ks[1], (H, E, Dh), minval=-lim_e, maxval=lim_e, dtype=jnp.float32)
    wk = jax.random.uniform(ks[2], (H, E, Dh), minval=-lim_e, maxval=lim_e, dtype=jnp.float32)
    wv = jax.random.uniform(ks[3], (H, E, Dh), minval=-lim_e, maxval=lim_e, dtype=jnp.float32)
    wp_t = jax.random.uniform(ks[4], (H * Dh, E), minval=-lim_hd, maxval=lim_hd, dtype=jnp.float32)
    bp = jax.random.uniform(ks[5], (E,), minval=-lim_hd, maxval=lim_hd, dtype=jnp.float32)

    out = multi_head_attention(x, wq, wk, wv, wp_t, bp)
    out = jax.block_until_ready(out)

    ref = reference_mha(x, wq, wk, wv, wp_t, bp)
    assert out.shape == (B, S, E)
    # Tolerance reflects bf16 MXU operands (per perf review); accumulation is
    # f32 so the error stays bounded well below this.
    assert jnp.allclose(out, ref, atol=2e-2, rtol=2e-2), "Pallas output mismatch vs reference"

    print("KERNEL_OK")
</pallas_src>

<mosaic_0001>
module attributes {stable_mosaic.version = 11 : i64} {
  func.func @mha_kernel(%arg0: i32, %arg1: i32, %arg2: memref<1x8x128xf32, #tpu.memory_space<vmem>>, %arg3: memref<1x3x128x8xbf16, #tpu.memory_space<vmem>>, %arg4: memref<1x8x128xbf16, #tpu.memory_space<vmem>>, %arg5: memref<1x128xf32, #tpu.memory_space<vmem>>, %arg6: memref<1x8x128xf32, #tpu.memory_space<vmem>>, %arg7: memref<8x128xf32, #tpu.memory_space<vmem>>) attributes {dimension_semantics = [#tpu.dimension_semantics<parallel>, #tpu.dimension_semantics<arbitrary>], iteration_bounds = array<i64: 2, 4>, scalar_prefetch = 0 : i64, scratch_operands = 1 : i64, tpu.core_type = #tpu.core_type<tc>, window_params = [{transform_indices = @transform_0, window_bounds = array<i64: 1, 8, 128>}, {transform_indices = @transform_1, window_bounds = array<i64: 1, 3, 128, 8>}, {transform_indices = @transform_2, window_bounds = array<i64: 1, 8, 128>}, {pipeline_mode = #tpu.pipeline_mode<synchronous>, transform_indices = @transform_3, window_bounds = array<i64: 1, 128>}, {transform_indices = @transform_4, window_bounds = array<i64: 1, 8, 128>}]} {
    %c0_i32 = arith.constant 0 : i32
    %0 = arith.cmpi eq, %arg1, %c0_i32 : i32
    %1 = arith.extui %0 : i1 to i32
    %c0_i32_0 = arith.constant 0 : i32
    %2 = arith.cmpi ne, %1, %c0_i32_0 : i32
    scf.if %2 {
      %cst_28 = arith.constant 0.000000e+00 : f32
      %44 = vector.broadcast %cst_28 : f32 to vector<8x128xf32>
      %c0_29 = arith.constant 0 : index
      %c0_30 = arith.constant 0 : index
      %45 = vector.load %arg7[%c0_29, %c0_30] : memref<8x128xf32, #tpu.memory_space<vmem>>, vector<8x128xf32>
      tpu.vector_store %arg7[%c0_29, %c0_30], %44 {strides = array<i32>} : memref<8x128xf32, #tpu.memory_space<vmem>>, vector<8x128xf32>,
    } else {
    }
    %c0 = arith.constant 0 : index
    %c0_1 = arith.constant 0 : index
    %c0_2 = arith.constant 0 : index
    %3 = vector.load %arg2[%c0, %c0_1, %c0_2] : memref<1x8x128xf32, #tpu.memory_space<vmem>>, vector<1x8x128xf32>
    %4 = vector.shape_cast %3 : vector<1x8x128xf32> to vector<8x128xf32>
    %5 = arith.truncf %4 : vector<8x128xf32> to vector<8x128xbf16>
    %c0_3 = arith.constant 0 : index
    %c0_4 = arith.constant 0 : index
    %c0_5 = arith.constant 0 : index
    %c0_6 = arith.constant 0 : index
    %6 = vector.load %arg3[%c0_3, %c0_4, %c0_5, %c0_6] : memref<1x3x128x8xbf16, #tpu.memory_space<vmem>>, vector<1x1x128x8xbf16>
    %7 = vector.shape_cast %6 : vector<1x1x128x8xbf16> to vector<128x8xbf16>
    %cst = arith.constant dense<0.000000e+00> : vector<8x8xf32>
    %8 = tpu.matmul %5, %7, %cst {dimension_numbers = #tpu.dot_dimension_numbers<[1], [0], [0], [1], [0, 0, 1, 1], [], []>} : vector<8x128xbf16>, vector<128x8xbf16>, vector<8x8xf32> -> vector<8x8xf32>
    %c0_7 = arith.constant 0 : index
    %c1 = arith.constant 1 : index
    %c0_8 = arith.constant 0 : index
    %c0_9 = arith.constant 0 : index
    %9 = vector.load %arg3[%c0_7, %c1, %c0_8, %c0_9] : memref<1x3x128x8xbf16, #tpu.memory_space<vmem>>, vector<1x1x128x8xbf16>
    %10 = vector.shape_cast %9 : vector<1x1x128x8xbf16> to vector<128x8xbf16>
    %cst_10 = arith.constant dense<0.000000e+00> : vector<8x8xf32>
    %11 = tpu.matmul %5, %10, %cst_10 {dimension_numbers = #tpu.dot_dimension_numbers<[1], [0], [0], [1], [0, 0, 1, 1], [], []>} : vector<8x128xbf16>, vector<128x8xbf16>, vector<8x8xf32> -> vector<8x8xf32>
    %c0_11 = arith.constant 0 : index
    %c2 = arith.constant 2 : index
    %c0_12 = arith.constant 0 : index
    %c0_13 = arith.constant 0 : index
    %12 = vector.load %arg3[%c0_11, %c2, %c0_12, %c0_13] : memref<1x3x128x8xbf16, #tpu.memory_space<vmem>>, vector<1x1x128x8xbf16>
    %13 = vector.shape_cast %12 : vector<1x1x128x8xbf16> to vector<128x8xbf16>
    %cst_14 = arith.constant dense<0.000000e+00> : vector<8x8xf32>
    %14 = tpu.matmul %5, %13, %cst_14 {dimension_numbers = #tpu.dot_dimension_numbers<[1], [0], [0], [1], [0, 0, 1, 1], [], []>} : vector<8x128xbf16>, vector<128x8xbf16>, vector<8x8xf32> -> vector<8x8xf32>
    %15 = vector.shape_cast %8 : vector<8x8xf32> to vector<1x8x8xf32>
    %16 = arith.truncf %15 : vector<1x8x8xf32> to vector<1x8x8xbf16>
    %17 = vector.shape_cast %11 : vector<8x8xf32> to vector<1x8x8xf32>
    %18 = arith.truncf %17 : vector<1x8x8xf32> to vector<1x8x8xbf16>
    %19 = vector.shape_cast %14 : vector<8x8xf32> to vector<1x8x8xf32>
    %20 = arith.truncf %19 : vector<1x8x8xf32> to vector<1x8x8xbf16>
    "tpu.trace_start"() <{level = 10 : i32, message = "bqd,bkd->bqk"}> : () -> ()
    %cst_15 = arith.constant dense<0.000000e+00> : vector<1x8x8xf32>
    %21 = tpu.matmul %16, %18, %cst_15 {dimension_numbers = #tpu.dot_dimension_numbers<[2], [2], [1], [1], [0, 0, 0, 1, 1, 1], [0], [0]>} : vector<1x8x8xbf16>, vector<1x8x8xbf16>, vector<1x8x8xf32> -> vector<1x8x8xf32>
    "tpu.trace_stop"() : () -> ()
    %cst_16 = arith.constant dense<0xFF800000> : vector<1x8xf32>
    %22 = vector.multi_reduction <maximumf>, %21, %cst_16 [2] : vector<1x8x8xf32> to vector<1x8xf32>
    %23 = vector.shape_cast %22 : vector<1x8xf32> to vector<1x8x1xf32>
    %24 = vector.broadcast %23 : vector<1x8x1xf32> to vector<1x8x8xf32>
    %25 = arith.subf %21, %24 : vector<1x8x8xf32>
    %26 = math.exp %25 : vector<1x8x8xf32>
    %cst_17 = arith.constant dense<0.000000e+00> : vector<1x8xf32>
    %27 = vector.multi_reduction <add>, %26, %cst_17 [2] : vector<1x8x8xf32> to vector<1x8xf32>
    %28 = vector.shape_cast %27 : vector<1x8xf32> to vector<1x8x1xf32>
    %29 = vector.broadcast %28 : vector<1x8x1xf32> to vector<1x8x8xf32>
    %30 = arith.divf %26, %29 : vector<1x8x8xf32>
    %31 = arith.truncf %30 : vector<1x8x8xf32> to vector<1x8x8xbf16>
    "tpu.trace_start"() <{level = 10 : i32, message = "bqk,bkd->bqd"}> : () -> ()
    %cst_18 = arith.constant dense<0.000000e+00> : vector<1x8x8xf32>
    %32 = tpu.matmul %31, %20, %cst_18 {dimension_numbers = #tpu.dot_dimension_numbers<[2], [1], [1], [2], [0, 0, 0, 1, 1, 2], [0], [0]>} : vector<1x8x8xbf16>, vector<1x8x8xbf16>, vector<1x8x8xf32> -> vector<1x8x8xf32>
    "tpu.trace_stop"() : () -> ()
    %c0_19 = arith.constant 0 : index
    %c0_20 = arith.constant 0 : index
    %33 = vector.load %arg7[%c0_19, %c0_20] : memref<8x128xf32, #tpu.memory_space<vmem>>, vector<8x128xf32>
    %34 = vector.shape_cast %32 : vector<1x8x8xf32> to vector<8x8xf32>
    %35 = arith.truncf %34 : vector<8x8xf32> to vector<8x8xbf16>
    %c0_21 = arith.constant 0 : index
    %c0_22 = arith.constant 0 : index
    %c0_23 = arith.constant 0 : index
    %36 = vector.load %arg4[%c0_21, %c0_22, %c0_23] : memref<1x8x128xbf16, #tpu.memory_space<vmem>>, vector<1x8x128xbf16>
    %37 = vector.shape_cast %36 : vector<1x8x128xbf16> to vector<8x128xbf16>
    %cst_24 = arith.constant dense<0.000000e+00> : vector<8x128xf32>
    %38 = tpu.matmul %35, %37, %cst_24 {dimension_numbers = #tpu.dot_dimension_numbers<[1], [0], [0], [1], [0, 0, 1, 1], [], []>} : vector<8x8xbf16>, vector<8x128xbf16>, vector<8x128xf32> -> vector<8x128xf32>
    %39 = arith.addf %33, %38 : vector<8x128xf32>
    %c0_25 = arith.constant 0 : index
    %c0_26 = arith.constant 0 : index
    %40 = vector.load %arg7[%c0_25, %c0_26] : memref<8x128xf32, #tpu.memory_space<vmem>>, vector<8x128xf32>
    tpu.vector_store %arg7[%c0_25, %c0_26], %39 {strides = array<i32>} : memref<8x128xf32, #tpu.memory_space<vmem>>, vector<8x128xf32>,
    %c3_i32 = arith.constant 3 : i32
    %41 = arith.cmpi eq, %arg1, %c3_i32 : i32
    %42 = arith.extui %41 : i1 to i32
    %c0_i32_27 = arith.constant 0 : i32
    %43 = arith.cmpi ne, %42, %c0_i32_27 : i32
    scf.if %43 {
      %c0_28 = arith.constant 0 : index
      %c0_29 = arith.constant 0 : index
      %44 = vector.load %arg7[%c0_28, %c0_29] : memref<8x128xf32, #tpu.memory_space<vmem>>, vector<8x128xf32>
      %c0_30 = arith.constant 0 : index
      %c0_31 = arith.constant 0 : index
      %45 = vector.load %arg5[%c0_30, %c0_31] : memref<1x128xf32, #tpu.memory_space<vmem>>, vector<1x128xf32>
      %46 = vector.broadcast %45 : vector<1x128xf32> to vector<8x128xf32>
      %47 = arith.addf %44, %46 : vector<8x128xf32>
      %48 = vector.shape_cast %47 : vector<8x128xf32> to vector<1x8x128xf32>
      %c0_32 = arith.constant 0 : index
      %c0_33 = arith.constant 0 : index
      %c0_34 = arith.constant 0 : index
      %49 = vector.load %arg6[%c0_32, %c0_33, %c0_34] : memref<1x8x128xf32, #tpu.memory_space<vmem>>, vector<1x8x128xf32>
      tpu.vector_store %arg6[%c0_32, %c0_33, %c0_34], %48 {strides = array<i32>} : memref<1x8x128xf32, #tpu.memory_space<vmem>>, vector<1x8x128xf32>,
    } else {
    }
    return
  }
  func.func @transform_0(%arg0: i32, %arg1: i32) -> (i32, i32, i32) {
    %c0_i32 = arith.constant 0 : i32
    %c0_i32_0 = arith.constant 0 : i32
    %c0_i32_1 = arith.constant 0 : i32
    return %arg0, %c0_i32, %c0_i32_0 : i32, i32, i32
  }
  func.func @transform_1(%arg0: i32, %arg1: i32) -> (i32, i32, i32, i32) {
    %c0_i32 = arith.constant 0 : i32
    %c0_i32_0 = arith.constant 0 : i32
    %c0_i32_1 = arith.constant 0 : i32
    %c0_i32_2 = arith.constant 0 : i32
    return %arg1, %c0_i32, %c0_i32_0, %c0_i32_1 : i32, i32, i32, i32
  }
  func.func @transform_2(%arg0: i32, %arg1: i32) -> (i32, i32, i32) {
    %c0_i32 = arith.constant 0 : i32
    %c0_i32_0 = arith.constant 0 : i32
    %c0_i32_1 = arith.constant 0 : i32
    return %arg1, %c0_i32, %c0_i32_0 : i32, i32, i32
  }
  func.func @transform_3(%arg0: i32, %arg1: i32) -> (i32, i32) {
    %c0_i32 = arith.constant 0 : i32
    %c0_i32_0 = arith.constant 0 : i32
    %c0_i32_1 = arith.constant 0 : i32
    return %c0_i32, %c0_i32_0 : i32, i32
  }
  func.func @transform_4(%arg0: i32, %arg1: i32) -> (i32, i32, i32) {
    %c0_i32 = arith.constant 0 : i32
    %c0_i32_0 = arith.constant 0 : i32
    %c0_i32_1 = arith.constant 0 : i32
    return %arg0, %c0_i32, %c0_i32_0 : i32, i32, i32
  }
}

</mosaic_0001>

<bundles_post_ra>
// kernel: tpu_custom_call.1
= control target key start
LH: loop header
LB: loop body
LE: loop exit
PB: predicated region body
PF: predicated region fallthrough
CT: control target
= control target key end

     0   :  { %9 = vsyncpa [#allocation4], 0  ;;  %s1487_s0 = inlined_call_operand.vmem [shape: f32[2,8,128], index: 0, kind: input, shape index: {}]   ;;  %s1488_s1 = inlined_call_operand.vmem [shape: bf16[4,3,128,8], index: 1, kind: input, shape index: {}]   ;;  %s1489_s2 = inlined_call_operand.vmem [shape: bf16[4,8,128], index: 2, kind: input, shape index: {}]   ;;  %s1490_s3 = inlined_call_operand.vmem [shape: f32[1,128], index: 3, kind: input, shape index: {}]   ;;  %s1491_s4 = inlined_call_operand.hbm [shape: f32[2,8,128], index: 4, kind: output, shape index: {}]  }
   0x1   :  { %11 = vsyncpa [#allocation4 + $0x1], 0  ;;  %s1260_s15 = smov 0   ;;  %s1262_s16 = smov 0  }
   0x2   :  { %s1264_s17 = smov 0   ;;  %s1266_s18 = smov 0  }
   0x3   :  { %s1268_s19 = smov 0   ;;  %s1270_s20 = smov 0  }
   0x4   :  { %s1272_s21 = smov 0   ;;  %s1274_s22 = smov 0  }
   0x5 LB: > { %1495 = sst [smem:[#allocation6_spill]] %s1225_s21  ;;  %s846_s23 = sadd.s32 4294967295, %s1229_s22   ;;  %s1229_s22 = sphi %s1274_s22, %s17_s22   ;;  %s1225_s21 = sphi %s1272_s21, %s1503_s21   ;;  %s1221_s20 = sphi %s1270_s20, %s1508_s20   ;;  %s1217_s19 = sphi %s1268_s19, %s1501_s19   ;;  %s1213_s18 = sphi %s1266_s18, %s1507_s18   ;;  %s1209_s17 = sphi %s1264_s17, %s1506_s17   ;;  %s1205_s16 = sphi %s1262_s16, %s1505_s16   ;;  %s1201_s15 = sphi %s1260_s15, %s1504_s15  }
   0x6   : > { %s847_s24 = sadd.s32 4294967294, %s1229_s22   ;;  %s26_s25 = sadd.s32 1, %s1221_s20 }
   0x7   : > { %p27_p0 = scmp.ge.s32.totalorder %s26_s25, 4  ;;  %s29_s26 = sadd.s32 1, %s1225_s21 }
   0x8   : > { %p145_p1 = scmp.ne.s32.totalorder %s1209_s17, %s1205_s16  ;;  %p146_p2 = scmp.eq.s32.totalorder %s846_s23, 7 }
   0x9   : > { %s1510_s25 = smov (%p27_p0, %s26_s25), 0  ;;  %s1512_s26 = smov (!%p27_p0, %s29_s26), %s1225_s21 }
   0xa   : > { %1496 = sst [smem:[#allocation7_spill]] %s1510_s25  ;;  %p1309_p3 = por %p146_p2, %p145_p1 }
   0xb   : > { %p151_p4 = scmp.ne.s32.totalorder %s1205_s16, %s1201_s15  ;;  %p31_p5 = scmp.ge.s32.totalorder %s1512_s26, 2 }
   0xc   : > { %p152_p6 = scmp.eq.s32.totalorder %s847_s24, 7  ;;  %p850_p7 = scmp.ge.s32.totalorder %s1229_s22, 1 }
   0xd   : > { %p195_p8 = scmp.lt.s32.totalorder %s1229_s22, 9  ;;  %s1514_s26 = smov (%p31_p5, %s1512_s26), 0 }
   0xe   : > { %1498 = sst [smem:[#allocation8_spill]] %s1514_s26  ;;  %p1319_p9 = por %p152_p6, %p151_p4 }
   0xf   : > { %p196_p10 = pnand %p850_p7, %p195_p8  ;;  %s132_s29 = ssub.s32 %s1225_s21, %s1514_s26 }
  0x10   : > { %s135_s30 = sadd.s32 1, %s1209_s17  ;;  %p133_p11 = scmp.eq.s32.totalorder %s132_s29, 0 }
  0x11   : > { %199 = sbr.rel (%p196_p10) target bundleno = 1280 (0x500), region = 36  ;;  %s1493_s6 = sand.u32 (!%p196_p10), 1, %s1205_s16  }
  0x12   : > { %s1327_s5 = scalar_select %p133_p11, %s1209_s17, %s135_s30  }
  0x13   : > { %p229_p12 = scmp.lt.s32.totalorder (!%p196_p10), %s1217_s19, 1  ;;  %s1333_s7 = sshll.u32 (!%p196_p10), %s1493_s6, 3 }
  0x14   : > { %p233_p13 = scmp.lt.s32.totalorder (!%p196_p10), %s1213_s18, 3  ;;  %s228_s21 = scalar_lea.vmem (!%p196_p10), [#allocation3], %s1333_s7 }
  0x15   : > { %p855_p0 = scmp.ne.s32.totalorder (!%p196_p10), %s1213_s18, 0 }
  0x18   : > { %s230_s8 = scalar_select %p229_p12, %s1217_s19, 1 }
  0x19   : > { %s234_s9 = scalar_select %p233_p13, %s1213_s18, 3 }
  0x1a   : > { %s852_s10 = sshll.u32 %s230_s8, 3  ;;  %246 = sbr.rel (%p855_p0) target bundleno = 33 (0x21), region = 40  ;;  %v1231_v0 = vmov (!%p855_p0), 0.0  }
  0x1b   : > { %s1341_s13 = scalar_lea.vmem %s1487_s0, %s852_s10  ;;  %s1032_s14 = smul.u32 192, %s234_s9  ;;  %247 = vst [vmem:[#allocation2] sm:$0xff] (!%p855_p0), %v1231_v0 }
  0x1c   : > { %s854_s23 = sshll.u32 %s234_s9, 2 }
  0x1d   : > { %s1346_s30 = scalar_lea.vmem %s1488_s1, %s1032_s14  ;;  %s1351_s25 = scalar_lea.vmem %s1489_s2, %s854_s23 }
  0x21 PF: > { %v1107_v1 = vld [vmem:[%s1346_s30 + $0x40] sm:$0xff]   ;;  %v1232_v2 = vmov 0.0   ;;  %v1108_v3 = vld [vmem:[%s1346_s30 + $0x48] sm:$0xff]   ;;  %vm1233_vm0 = vmmov 0   ;;  %v1110_v6 = vld [vmem:[%s1346_s30 + $0x50] sm:$0xff]   ;;  %vm567_vm1 = vcmask 64512  }
  0x22   : > { %974 = vmatprep.subr.bf16.mxu1 %v1232_v2  ;;  %954 = vmatprep.subr.bf16.mxu0 %v1232_v2  ;;  %v1109_v4 = vld [vmem:[%s1346_s30] sm:$0xff]   ;;  %v1111_v5 = vld [vmem:[%s1346_s30 + $0x8] sm:$0xff]   ;;  %v1113_v7 = vld [vmem:[%s1346_s30 + $0x10] sm:$0xff]   ;;  %vm629_vm2 = vcmask 1043456   ;;  %p915_p1 = scmp.ne.s32.totalorder %s1213_s18, 3 }
  0x23   : > { %975 = vmatpush3.bf16.msra.mxu1 %v1107_v1  ;;  %990 = vmatprep.mubr.msk.bf16.mxu1 %vm1233_vm0, %v1232_v2  ;;  %v1112_v8 = vld [vmem:[%s1346_s30 + $0x58] sm:$0xff]   ;;  %v1114_v10 = vld [vmem:[%s1346_s30 + $0x60] sm:$0xff]   ;;  %v1116_v11 = vld [vmem:[%s1346_s30 + $0x68] sm:$0xff]  }
  0x24   : > { %976 = vmatprep.subr.bf16.mxu1 %v1232_v2  ;;  %970 = vmatprep.mubr.msk.bf16.mxu0 %vm1233_vm0, %v1232_v2  ;;  %v1115_v9 = vld [vmem:[%s1346_s30 + $0x18] sm:$0xff]   ;;  %v1117_v12 = vld [vmem:[%s1346_s30 + $0x20] sm:$0xff]   ;;  %v1119_v13 = vld [vmem:[%s1346_s30 + $0x28] sm:$0xff]  }
  0x25   : > { %955 = vmatpush3.bf16.msra.mxu0 %v1109_v4  ;;  %v1118_v14 = vld [vmem:[%s1346_s30 + $0x70] sm:$0xff]   ;;  %v1120_v16 = vld [vmem:[%s1346_s30 + $0x78] sm:$0xff]   ;;  %v248_v17 = vld [vmem:[%s1341_s13] sm:$0xff] }
  0x26   : > { %956 = vmatprep.subr.bf16.mxu0 %v1232_v2  ;;  %v1121_v15 = vld [vmem:[%s1346_s30 + $0x30] sm:$0xff]   ;;  %v1122_v18 = vld [vmem:[%s1346_s30 + $0x38] sm:$0xff]   ;;  %v249_v19 = vpack.c.bf16 %v248_v17, %v248_v17  ;;  %v1123_v31 = vld [vmem:[%s1346_s30 + $0x80] sm:$0xff]  }
  0x27   : > { %977 = vmatpush3.bf16.msra.mxu1 %v1108_v3  ;;  %v1124_v32 = vld [vmem:[%s1346_s30 + $0x88] sm:$0xff]   ;;  %v1125_v33 = vld [vmem:[%s1346_s30 + $0x90] sm:$0xff]   ;;  %v1126_v34 = vld [vmem:[%s1346_s30 + $0x98] sm:$0xff]  }
  0x28   : > { %978 = vmatprep.subr.bf16.mxu1 %v1232_v2  ;;  %v1127_v35 = vld [vmem:[%s1346_s30 + $0xa0] sm:$0xff]   ;;  %v1128_v36 = vld [vmem:[%s1346_s30 + $0xa8] sm:$0xff]   ;;  %v1129_v37 = vld [vmem:[%s1346_s30 + $0xb0] sm:$0xff]  }
  0x29   : > { %957 = vmatpush3.bf16.msra.mxu0 %v1111_v5  ;;  %v1130_v38 = vld [vmem:[%s1346_s30 + $0xb8] sm:$0xff]   ;;  %v675_v57 = vld [vmem:[%s1351_s25] sm:$0xf] }
  0x2a   : > { %958 = vmatprep.subr.bf16.mxu0 %v1232_v2  ;;  %v680_v60 = vsel %vm629_vm2, %v675_v57, 0  ;;  %v673_v3 = vld [vmem:[#allocation2] sm:$0xff] }
  0x2b   : > { %979 = vmatpush3.bf16.msra.mxu1 %v1110_v6 }
  0x2c   : > { %980 = vmatprep.subr.bf16.mxu1 %v1232_v2 }
  0x2d   : > { %959 = vmatpush3.bf16.msra.mxu0 %v1113_v7 }
  0x2e   : > { %960 = vmatprep.subr.bf16.mxu0 %v1232_v2 }
  0x2f   : > { %981 = vmatpush3.bf16.msra.mxu1 %v1112_v8 }
  0x30   : > { %982 = vmatprep.subr.bf16.mxu1 %v1232_v2 }
  0x31   : > { %961 = vmatpush3.bf16.msra.mxu0 %v1115_v9 }
  0x32   : > { %962 = vmatprep.subr.bf16.mxu0 %v1232_v2 }
  0x33   : > { %983 = vmatpush3.bf16.msra.mxu1 %v1114_v10 }
  0x34   : > { %984 = vmatprep.subr.bf16.mxu1 %v1232_v2 }
  0x35   : > { %963 = vmatpush3.bf16.msra.mxu0 %v1117_v12 }
  0x36   : > { %964 = vmatprep.subr.bf16.mxu0 %v1232_v2 }
  0x37   : > { %985 = vmatpush3.bf16.msra.mxu1 %v1116_v11 }
  0x38   : > { %986 = vmatprep.subr.bf16.mxu1 %v1232_v2 }
  0x39   : > { %965 = vmatpush3.bf16.msra.mxu0 %v1119_v13 }
  0x3a   : > { %966 = vmatprep.subr.bf16.mxu0 %v1232_v2 }
  0x3b   : > { %987 = vmatpush3.bf16.msra.mxu1 %v1118_v14 }
  0x3c   : > { %988 = vmatprep.subr.bf16.mxu1 %v1232_v2 }
  0x3d   : > { %967 = vmatpush3.bf16.msra.mxu0 %v1121_v15 }
  0x3e   : > { %968 = vmatprep.subr.bf16.mxu0 %v1232_v2 }
  0x3f   : > { %989 = vmatpush3.bf16.msra.mxu1 %v1120_v16 }
  0x40   : > { %1014 = vmatprep.subr.bf16.mxu1 %v1232_v2 }
  0x41   : > { %969 = vmatpush3.bf16.msra.mxu0 %v1122_v18 }
  0x42   : > { %991 = vmatmul.mubr.bf16.vlgmr.msra.gmra.mrb[0].mxu1 %v249_v19  ;;  %994 = vmatprep.subr.bf16.mxu0 %v1232_v2 }
  0x43   : > { %1016 = vmatprep.mubr.msk.bf16.mxu1 %vm1233_vm0, %v1232_v2 }
  0x44   : > { %971 = vmatmul.mubr.bf16.vlgmr.msra.gmra.mrb[0].mxu0 %v249_v19 }
  0x45   : > { %1010 = vmatprep.mubr.msk.bf16.mxu0 %vm1233_vm0, %v1232_v2  ;;  %995 = vmatpush3.bf16.msra.mxu0 %v1123_v31 }
  0x46   : > { %996 = vmatprep.subr.bf16.mxu0 %v1232_v2 }
  0x49   : > { %997 = vmatpush3.bf16.msra.mxu0 %v1124_v32 }
  0x4a   : > { %998 = vmatprep.subr.bf16.mxu0 %v1232_v2 }
  0x4d   : > { %999 = vmatpush3.bf16.msra.mxu0 %v1125_v33 }
  0x4e   : > { %1000 = vmatprep.subr.bf16.mxu0 %v1232_v2 }
  0x51   : > { %1001 = vmatpush3.bf16.msra.mxu0 %v1126_v34 }
  0x52   : > { %1002 = vmatprep.subr.bf16.mxu0 %v1232_v2 }
  0x55   : > { %1003 = vmatpush3.bf16.msra.mxu0 %v1127_v35 }
  0x56   : > { %1004 = vmatprep.subr.bf16.mxu0 %v1232_v2 }
  0x59   : > { %1005 = vmatpush3.bf16.msra.mxu0 %v1128_v36 }
  0x5a   : > { %1006 = vmatprep.subr.bf16.mxu0 %v1232_v2 }
  0x5d   : > { %1007 = vmatpush3.bf16.msra.mxu0 %v1129_v37 }
  0x5e   : > { %1008 = vmatprep.subr.bf16.mxu0 %v1232_v2 }
  0x61   : > { %1009 = vmatpush3.bf16.msra.mxu0 %v1130_v38 }
  0x64   : > { %1011 = vmatmul.mubr.bf16.vlgmr.msra.gmra.mrb[4].mxu0 %v249_v19 }
 0x115   : > { %v453_v20 = vpop.f32.mrb[0].mxu1 }
 0x116   : > { %v565_v21 = vpack.c.bf16 %v453_v20, %v453_v20  ;;  %v992_v22 = vpop.f32.mrb[1].mxu1 }
 0x117   : > { %v456_v23 = vpop.f32.mrb[2].mxu1  ;;  %v348_v24 = vpop.f32.mrb[0].mxu0 }
 0x118   : > { %v572_v25 = vsel %vm567_vm1, %v565_v21, 0  ;;  %v993_v26 = vpop.f32.mrb[3].mxu1  ;;  %v972_v27 = vpop.f32.mrb[1].mxu0  ;;  %v564_v30 = vpack.c.bf16 %v348_v24, %v348_v24 }
 0x119   : > { %1015 = vmatpush3.bf16.xpose.msra.mxu1 %v572_v25  ;;  %v351_v28 = vpop.f32.mrb[2].mxu0 }
 0x11a   : > { %v973_v29 = vpop.f32.mrb[3].mxu0  ;;  %1020 = vmatprep.subr.bf16.mxu1 %v1232_v2 }
 0x120   : > { %1017 = vmatmul.mubr.msk.bf16.vlgmr.msra.gmra.mrb[4].mxu1 %vm567_vm1, %v564_v30 }
 0x121   : > { %1022 = vmatprep.mubr.msk.bf16.mxu1 %vm1233_vm0, %v1232_v2 }
 0x137   : > { %v558_v49 = vpop.f32.mrb[4].mxu0 }
 0x138   : > { %v1012_v50 = vpop.f32.mrb[5].mxu0  ;;  %v566_v53 = vpack.c.bf16 %v558_v49, %v558_v49 }
 0x139   : > { %v561_v51 = vpop.f32.mrb[6].mxu0 }
 0x13a   : > { %v1013_v52 = vpop.f32.mrb[7].mxu0  ;;  %v631_v54 = vsel %vm629_vm2, %v566_v53, 0 }
 0x13b   : > { %1021 = vmatpush3.bf16.msra.mxu1 %v631_v54 }
 0x13c   : > { %1026 = vmatprep.subr.bf16.mxu1 %v1232_v2 }
 0x1f3   : > { %v608_v39 = vpop.f32.mrb[4].mxu1 }
 0x1f4   : > { %v1018_v40 = vpop.f32.mrb[5].mxu1  ;;  %v614_v41 = vsel %vm567_vm1, %v608_v39, -inf }
 0x1f5   : > { %615 = vmax.xlane.f32.xlu0 %v614_v41  ;;  %v611_v42 = vpop.f32.mrb[6].mxu1 }
 0x1f6   : > { %v1019_v43 = vpop.f32.mrb[7].mxu1 }
 0x282   : > { %v616_v44 = vpop.xlane.xlu0 %615 }
 0x283   : > { %v617_v45 = vsub.f32 %v608_v39, %v616_v44 }
 0x285   : > { %v618_v46 = vmul.f32 1.442695, %v617_v45 }
 0x287   : > { %1131 = vpow2.f32 %v618_v46 }
 0x291   : > { %v1132_v47 = vpop.eup %1131 }
 0x292   : > { %v620_v48 = vsel %vm567_vm1, %v1132_v47, 0.0 }
 0x293   : > { %621 = vadd.xlane.f32.xlu0 %v620_v48 }
 0x320   : > { %v622_v55 = vpop.xlane.xlu0 %621 }
 0x321   : > { %1133 = vrcp.f32 %v622_v55 }
 0x32b   : > { %v1134_v56 = vpop.eup %1133 }
 0x32c   : > { %v624_v58 = vmul.f32 %v1134_v56, %v1132_v47 }
 0x32e   : > { %v625_v59 = vpack.c.bf16 %v624_v58, %v624_v58 }
 0x330   : > { %1023 = vmatmul.mubr.msk.bf16.vlgmr.msra.gmra.mrb[8].mxu1 %vm567_vm1, %v625_v59 }
 0x331   : > { %1027 = vmatpush3.bf16.msra.mxu1 %v680_v60  ;;  %1028 = vmatprep.mubr.msk.bf16.mxu1 %vm1233_vm0, %v1232_v2  ;;  %v916_v2 = vld [vmem:[%s1490_s3] ss:$0 sm:$0xff] (!%p915_p1) }
 0x403   : > { %v667_v61 = vpop.f32.mrb[8].mxu1 }
 0x404   : > { %v674_v62 = vpack.c.bf16 %v667_v61, %v667_v61  ;;  %v1024_v63 = vpop.f32.mrb[9].mxu1 }
 0x405   : > { %v670_v0 = vpop.f32.mrb[10].mxu1 }
 0x406   : > { %v1025_v1 = vpop.f32.mrb[11].mxu1  ;;  %1029 = vmatmul.mubr.msk.bf16.vlgmr.msra.gmra.mrb[12].mxu1 %vm567_vm1, %v674_v62 }
 0x4d6   : > { %727 = sbr.rel (%p915_p1) target bundleno = 1255 (0x4e7), region = 44 }
 0x4d9   : > { %v716_v4 = vpop.f32.mrb[12].mxu1 }
 0x4da   : > { %v722_v5 = vadd.f32 %v716_v4, %v673_v3  ;;  %v1030_v6 = vpop.f32.mrb[13].mxu1 }
 0x4db   : > { %v719_v7 = vpop.f32.mrb[14].mxu1 }
 0x4dc   : > { %723 = vst [vmem:[#allocation2] sm:$0xff] %v722_v5  ;;  %v1031_v8 = vpop.f32.mrb[15].mxu1 }
 0x4e3   : > { %v728_v9 = vld [vmem:[#allocation2] sm:$0xff] }
 0x4e4   : > { %v736_v10 = vadd.f32 %v916_v2, %v728_v9 }
 0x4e6   : > { %737 = vst [vmem:[%s228_s21] sm:$0xff] %v736_v10 }
 0x4e7 PF: > { %s918_s6 = sshll.u32 %s1217_s19, 7  ;;  %s752_s10 = sshll.u32 %s228_s21, 4  ;;  %s753_s10 = int_to_ptr.vmem [resolvable:$true] %s752_s10 }
 0x4e8   : > { %s1436_s18 = scalar_lea.hbm %s1491_s4, %s918_s6  ;;  %s1500_s11 = sand.u32 1, %s1205_s16  }
 0x4e9   : > { %s739_s12 = scalar_lea.sflag [#allocation4], %s1500_s11  ;;  %s1135_s13 = scalar_lea.vmem %s753_s10, 128 }
 0x4ea   : > { %p1136_p2 = scmp.ne.s32.totalorder %s753_s10, %s1135_s13  ;;  %s1234_s14 = smov [#allocation3]  }
 0x4eb   : > { %s1139_s23 = sshll.u32 %s1234_s14, 4  ;;  %s1140_s23 = int_to_ptr.vmem [resolvable:$false] %s1139_s23 }
 0x4ec   : > { %p1137_p4 = pnand %p1136_p2, %p1309_p3  ;;  %s1141_s24 = scalar_lea.vmem %s1140_s23, 256 }
 0x4ed   : > { %p1142_p6 = scmp.lt.s32.totalorder %s753_s10, %s1140_s23  ;;  %p1143_p7 = scmp.lt.s32.totalorder %s1141_s24, %s1135_s13 }
 0x4ee   : > { %p1138_p5 = pneg %p1137_p4 }
 0x4ef   : > { %p1144_p8 = por %p1143_p7, %p1142_p6 }
 0x4f1   : > { %p1145_p10 = pnand %p1144_p8, %p1138_p5 }
 0x4f3   : > { %1148 = shalt.err (!%p1145_p10)
}
 0x4f4   : > { %s1149_s19 = scalar_lea.hbm %s1436_s18, 128  ;;  %s1153_s29 = scalar_lea.hbm %s1491_s4, 256 }
 0x4f5   : > { %p1150_p11 = scmp.ne.s32.totalorder %s1436_s18, %s1149_s19  ;;  %p1154_p0 = scmp.lt.u32.totalorder %s1436_s18, %s1491_s4 }
 0x4f6   : > { %p1155_p1 = scmp.lt.u32.totalorder %s1153_s29, %s1149_s19  ;;  %p1157_p4 = scmp.lt.u32.totalorder %s1149_s19, %s1436_s18 }
 0x4f7   : > { %p1151_p12 = pnand %p1150_p11, %p1309_p3 }
 0x4f8   : > { %p1156_p2 = por %p1155_p1, %p1154_p0 }
 0x4f9   : > { %p1152_p13 = pneg %p1151_p12 }
 0x4fa   : > { %p1158_p5 = por %p1157_p4, %p1156_p2 }
 0x4fc   : > { %p1159_p6 = pnand %p1158_p5, %p1152_p13 }
 0x4fe   : > { %1162 = shalt.err (!%p1159_p6)
}
 0x4ff   : > { %1033 = dma.vmem_to_hbm [thread:$0]  (%p1309_p3), %s753_s10, 128, %s1436_s18, %s739_s12  }
 0x500 PF: > { %p1039_p7 = scmp.ge.s32.totalorder %s1229_s22, 2  ;;  %s764_s26 = sand.u32 1, %s1201_s15  }
 0x501   : > { %s765_s6 = scalar_lea.sflag [#allocation4], %s764_s26 }
 0x502   : > { %p1036_p8 = pnand %p1039_p7, %p1319_p9 }
 0x504   : > { %1196 = dma.done.wait (!%p1036_p8), %s765_s6, 128  }
 0x505   : > { %1198 = vsyncadd (!%p1036_p8), %s765_s6, 4294967168  ;;  %s17_s22 = sadd.s32 1, %s1229_s22   ;;  %s1501_s19 = sld [smem:[#allocation6_spill]] }
 0x506   : > { %p14_p10 = scmp.ge.s32.totalorder %s17_s22, 10   ;;  %s1502_s27 = sld [smem:[#allocation7_spill]] }
 0x507   : > { %s1503_s21 = sld [smem:[#allocation8_spill]]  ;;  %s1504_s15 = smov %s1205_s16 }
 0x508   : > { %s1505_s16 = smov %s1209_s17  ;;  %s1506_s17 = smov %s1327_s5 }
 0x509   : > { %s1507_s18 = smov %s1221_s20  ;;  %16 = sbr.rel (!%p14_p10) target bundleno = 5 (0x5), region = 87 }
 0x50c   : > { %s1508_s20 = smov %s1502_s27 }
 0x510   :  { %770 = vsyncpa [#allocation4], 1 }
 0x511   :  { %772 = vsyncpa [#allocation4 + $0x1], 1 }

</bundles_post_ra>
